<compile_context>
chip_gen: v5e
topology: v5e:2x2
jax: 0.10.0
libtpu: 0.0.40
codegen_flags: <defaults>
</compile_context>

<pallas_src>
import math
from functools import partial

import jax
import jax.numpy as jnp
from jax import lax
from jax.experimental import pallas as pl
from jax.experimental.pallas import tpu as pltpu


_VMEM_LIMIT = 48 * 1024 * 1024   # explicit budget: fits v7x (64 MiB physical) with headroom


def _pick_tile(dim: int, pref: int, align: int) -> int:
    """Largest divisor of `dim` that is <= `pref` and a multiple of `align`.
    Falls back to the full extent (always legal w.r.t. the (8,128) rule)."""
    if dim <= pref:
        return dim
    for cand in range(pref, align - 1, -1):
        if cand % align == 0 and dim % cand == 0:
            return cand
    return dim


# ---------------------------------------------------------------------------
# Linear: y = x @ w + b   (w stored (in, out); same math as torch nn.Linear)
# ---------------------------------------------------------------------------
def _linear_kernel(x_ref, w_ref, b_ref, o_ref, acc_ref):
    k = pl.program_id(2)

    @pl.when(k == 0)
    def _():
        acc_ref[...] = jnp.zeros_like(acc_ref)

    # Operands stay in their native dtype (bf16 feeds the MXU as bf16),
    # accumulation is f32 via preferred_element_type.
    acc_ref[...] += jnp.dot(x_ref[...], w_ref[...],
                            preferred_element_type=jnp.float32)

    @pl.when(k == pl.num_programs(2) - 1)
    def _():
        o_ref[...] = (acc_ref[...] + b_ref[...].astype(jnp.float32)).astype(o_ref.dtype)


def linear(x, w, b, *, tm=512, tn=512, tk=512):
    """x: (M, K), w: (K, N), b: (N,) -> (M, N)"""
    M, K = x.shape
    Kw, N = w.shape
    assert K == Kw
    tm = _pick_tile(M, tm, 8)     # sublane dim of x / out blocks
    tn = _pick_tile(N, tn, 128)   # lane dim of w / out blocks
    tk = _pick_tile(K, tk, 128)   # lane dim of x block, sublane dim of w block
    b2 = b.reshape(1, N)

    return pl.pallas_call(
        _linear_kernel,
        out_shape=jax.ShapeDtypeStruct((M, N), x.dtype),
        grid_spec=pltpu.PrefetchScalarGridSpec(
            num_scalar_prefetch=0,
            grid=(M // tm, N // tn, K // tk),
            in_specs=[
                pl.BlockSpec((tm, tk), lambda i, j, k: (i, k)),
                pl.BlockSpec((tk, tn), lambda i, j, k: (k, j)),
                pl.BlockSpec((1, tn), lambda i, j, k: (0, j)),
            ],
            out_specs=pl.BlockSpec((tm, tn), lambda i, j, k: (i, j)),
            scratch_shapes=[pltpu.VMEM((tm, tn), jnp.float32)],
        ),
        compiler_params=pltpu.CompilerParams(
            dimension_semantics=("parallel", "parallel", "arbitrary"),
            vmem_limit_bytes=_VMEM_LIMIT),
    )(x, w, b2)


# ---------------------------------------------------------------------------
# Scaled-dot-product attention (flash style, online softmax), no mask.
# q, k, v arrive in (B, T, D) layout; heads are split inside the kernel on the
# VMEM tile, so the output store is a lane-dense (tq, D) block and no HBM
# head split/merge relayout is ever performed.
# ---------------------------------------------------------------------------
def _attn_kernel(q_ref, k_ref, v_ref, o_ref, m_sc, l_sc, acc_sc, *,
                 scale, num_heads, dk):
    kv = pl.program_id(2)

    @pl.when(kv == 0)
    def _():
        m_sc[...] = jnp.full(m_sc.shape, -jnp.inf, dtype=jnp.float32)
        l_sc[...] = jnp.zeros_like(l_sc)
        acc_sc[...] = jnp.zeros_like(acc_sc)

    # Pre-scale q (tq*D multiplies instead of tq*tk); keep MXU operand dtype.
    q = q_ref[...] * scale        # (tq, D)
    k = k_ref[...]                # (tk, D)
    v = v_ref[...]                # (tk, D)

    # All heads handled in one grid step via static lane slices of the tile.
    for h in range(num_heads):
        sl = slice(h * dk, (h + 1) * dk)
        s = lax.dot_general(q[:, sl], k[:, sl], (((1,), (1,)), ((), ())),
                            preferred_element_type=jnp.float32)       # (tq, tk)
        m_prev = m_sc[h]                                              # (tq, 1)
        m_new = jnp.maximum(m_prev, s.max(axis=-1, keepdims=True))
        alpha = jnp.exp(m_prev - m_new)
        p = jnp.exp(s - m_new)                                        # f32 softmax math
        l_sc[h] = alpha * l_sc[h] + p.sum(axis=-1, keepdims=True)
        acc_sc[h] = alpha * acc_sc[h] + jnp.dot(
            p.astype(v.dtype), v[:, sl], preferred_element_type=jnp.float32)
        m_sc[h] = m_new

    @pl.when(kv == pl.num_programs(2) - 1)
    def _():
        l = l_sc[...]                                                 # (H, tq, 1)
        inv_l = pl.reciprocal(l, approx=True)                         # EUP slot
        inv_l = inv_l * (2.0 - l * inv_l)                             # Newton step -> f32 accurate
        ctx = acc_sc[...] * inv_l                                     # (H, tq, dk)
        # Merge heads back to (tq, D) and do one lane-dense store.
        o_ref[...] = jnp.concatenate(
            [ctx[h] for h in range(num_heads)], axis=-1).astype(o_ref.dtype)


def mha_attention(q, k, v, *, num_heads, scale, tq=256, tk=512):
    """q: (B, Tq, D), k/v: (B, Tk, D) -> (B, Tq, D). No mask."""
    B, Tq, D = q.shape
    _, Tk, _ = k.shape
    dk = D // num_heads
    tq = _pick_tile(Tq, tq, 8)
    tk = _pick_tile(Tk, tk, 8)

    kernel = partial(_attn_kernel, scale=scale, num_heads=num_heads, dk=dk)
    return pl.pallas_call(
        kernel,
        out_shape=jax.ShapeDtypeStruct((B, Tq, D), q.dtype),
        grid_spec=pltpu.PrefetchScalarGridSpec(
            num_scalar_prefetch=0,
            grid=(B, Tq // tq, Tk // tk),
            in_specs=[
                pl.BlockSpec((pl.Squeezed(), tq, D), lambda b, qi, ki: (b, qi, 0)),
                pl.BlockSpec((pl.Squeezed(), tk, D), lambda b, qi, ki: (b, ki, 0)),
                pl.BlockSpec((pl.Squeezed(), tk, D), lambda b, qi, ki: (b, ki, 0)),
            ],
            out_specs=pl.BlockSpec((pl.Squeezed(), tq, D),
                                   lambda b, qi, ki: (b, qi, 0)),
            scratch_shapes=[
                pltpu.VMEM((num_heads, tq, 1), jnp.float32),    # running max per head
                pltpu.VMEM((num_heads, tq, 1), jnp.float32),    # running denom per head
                pltpu.VMEM((num_heads, tq, dk), jnp.float32),   # output accumulator
            ],
        ),
        compiler_params=pltpu.CompilerParams(
            dimension_semantics=("parallel", "parallel", "arbitrary"),
            vmem_limit_bytes=_VMEM_LIMIT),
    )(q, k, v)


# ---------------------------------------------------------------------------
# Full MultiHeadAttention forward (matches the PyTorch module semantics)
# ---------------------------------------------------------------------------
def multi_head_attention_forward(params, Q, K, V, *, num_heads, mask=None):
    # TODO(synk): optional attention mask path (mask != None) is not implemented
    # in the Pallas attention kernel; the module default (mask=None) is covered.
    assert mask is None, "mask is not supported in this Pallas implementation"

    B, Tq, D = Q.shape
    _, Tk, _ = K.shape
    dk = D // num_heads

    if (Q is K) and (K is V):
        # Self-attention: fused QKV projection (one activation read, one matmul).
        w_qkv = jnp.concatenate([params["w_q"], params["w_k"], params["w_v"]], axis=1)
        b_qkv = jnp.concatenate([params["b_q"], params["b_k"], params["b_v"]])
        qkv = linear(Q.reshape(B * Tq, D), w_qkv, b_qkv)            # (B*Tq, 3D)
        qp = qkv[:, :D].reshape(B, Tq, D)
        kp = qkv[:, D:2 * D].reshape(B, Tk, D)
        vp = qkv[:, 2 * D:].reshape(B, Tk, D)
    else:
        qp = linear(Q.reshape(B * Tq, D), params["w_q"], params["b_q"]).reshape(B, Tq, D)
        kp = linear(K.reshape(B * Tk, D), params["w_k"], params["b_k"]).reshape(B, Tk, D)
        vp = linear(V.reshape(B * Tk, D), params["w_v"], params["b_v"]).reshape(B, Tk, D)

    # No head split/merge transposes in the wrapper: heads are handled in-kernel.
    ctx = mha_attention(qp, kp, vp, num_heads=num_heads,
                        scale=1.0 / math.sqrt(dk))                   # (B, Tq, D)

    return linear(ctx.reshape(B * Tq, D), params["w_o"], params["b_o"]).reshape(B, Tq, D)


# ---------------------------------------------------------------------------
# Pure-JAX reference (same math as the PyTorch module forward)
# ---------------------------------------------------------------------------
def reference_mha(params, Q, K, V, *, num_heads):
    B, Tq, D = Q.shape
    _, Tk, _ = K.shape
    dk = D // num_heads
    qp = Q @ params["w_q"] + params["b_q"]
    kp = K @ params["w_k"] + params["b_k"]
    vp = V @ params["w_v"] + params["b_v"]
    qh = qp.reshape(B, Tq, num_heads, dk).transpose(0, 2, 1, 3)
    kh = kp.reshape(B, Tk, num_heads, dk).transpose(0, 2, 1, 3)
    vh = vp.reshape(B, Tk, num_heads, dk).transpose(0, 2, 1, 3)
    scores = jnp.einsum("bhqd,bhkd->bhqk", qh, kh) / math.sqrt(dk)
    attn = jax.nn.softmax(scores, axis=-1)
    ctx = jnp.einsum("bhqk,bhkd->bhqd", attn, vh)
    ctx = ctx.transpose(0, 2, 1, 3).reshape(B, Tq, D)
    return ctx @ params["w_o"] + params["b_o"]


if __name__ == "__main__":
    # Small shapes consistent with the module: batch=2, seq=8, d_model=32, heads=4
    B, T, D, H = 2, 8, 32, 4
    key = jax.random.PRNGKey(0)
    kq, kk, kv, kw1, kw2, kw3, kw4, kb = jax.random.split(key, 8)

    Q = jax.random.normal(kq, (B, T, D), dtype=jnp.float32)
    K = jax.random.normal(kk, (B, T, D), dtype=jnp.float32)
    V = jax.random.normal(kv, (B, T, D), dtype=jnp.float32)

    scale = 1.0 / math.sqrt(D)
    params = {
        "w_q": jax.random.normal(kw1, (D, D), dtype=jnp.float32) * scale,
        "w_k": jax.random.normal(kw2, (D, D), dtype=jnp.float32) * scale,
        "w_v": jax.random.normal(kw3, (D, D), dtype=jnp.float32) * scale,
        "w_o": jax.random.normal(kw4, (D, D), dtype=jnp.float32) * scale,
        "b_q": jax.random.normal(kb, (D,), dtype=jnp.float32) * 0.1,
        "b_k": jnp.zeros((D,), dtype=jnp.float32),
        "b_v": jnp.zeros((D,), dtype=jnp.float32),
        "b_o": jnp.zeros((D,), dtype=jnp.float32),
    }

    # 1) General (cross-attention style) path: distinct Q, K, V.
    out = multi_head_attention_forward(params, Q, K, V, num_heads=H, mask=None)
    out = jax.block_until_ready(out)
    ref = reference_mha(params, Q, K, V, num_heads=H)
    assert out.shape == (B, T, D)
    assert jnp.allclose(out, ref, atol=2e-3, rtol=2e-3), "mismatch vs reference (cross)"

    # 2) Self-attention path: exercises the fused QKV projection.
    out_sa = multi_head_attention_forward(params, Q, Q, Q, num_heads=H, mask=None)
    out_sa = jax.block_until_ready(out_sa)
    ref_sa = reference_mha(params, Q, Q, Q, num_heads=H)
    assert jnp.allclose(out_sa, ref_sa, atol=2e-3, rtol=2e-3), "mismatch vs reference (self)"

    print("KERNEL_OK")
</pallas_src>

<mosaic_0001>
module attributes {stable_mosaic.version = 11 : i64} {
  func.func @_linear_kernel(%arg0: i32, %arg1: i32, %arg2: i32, %arg3: memref<16x32xf32, #tpu.memory_space<vmem>>, %arg4: memref<32x32xf32, #tpu.memory_space<vmem>>, %arg5: memref<1x32xf32, #tpu.memory_space<vmem>>, %arg6: memref<16x32xf32, #tpu.memory_space<vmem>>, %arg7: memref<16x32xf32, #tpu.memory_space<vmem>>) attributes {dimension_semantics = [#tpu.dimension_semantics<parallel>, #tpu.dimension_semantics<parallel>, #tpu.dimension_semantics<arbitrary>], iteration_bounds = array<i64: 1, 1, 1>, scalar_prefetch = 0 : i64, scratch_operands = 1 : i64, tpu.core_type = #tpu.core_type<tc>, window_params = [{transform_indices = @transform_0, window_bounds = array<i64: 16, 32>}, {transform_indices = @transform_1, window_bounds = array<i64: 32, 32>}, {transform_indices = @transform_2, window_bounds = array<i64: 1, 32>}, {transform_indices = @transform_3, window_bounds = array<i64: 16, 32>}]} {
    %c0_i32 = arith.constant 0 : i32
    %0 = arith.cmpi eq, %arg2, %c0_i32 : i32
    %1 = arith.extui %0 : i1 to i32
    %c0_i32_0 = arith.constant 0 : i32
    %2 = arith.cmpi ne, %1, %c0_i32_0 : i32
    scf.if %2 {
      %cst_10 = arith.constant 0.000000e+00 : f32
      %12 = vector.broadcast %cst_10 : f32 to vector<16x32xf32>
      %c0_11 = arith.constant 0 : index
      %c0_12 = arith.constant 0 : index
      %13 = vector.load %arg7[%c0_11, %c0_12] : memref<16x32xf32, #tpu.memory_space<vmem>>, vector<16x32xf32>
      tpu.vector_store %arg7[%c0_11, %c0_12], %12 {strides = array<i32>} : memref<16x32xf32, #tpu.memory_space<vmem>>, vector<16x32xf32>,
    } else {
    }
    %c0 = arith.constant 0 : index
    %c0_1 = arith.constant 0 : index
    %3 = vector.load %arg7[%c0, %c0_1] : memref<16x32xf32, #tpu.memory_space<vmem>>, vector<16x32xf32>
    %c0_2 = arith.constant 0 : index
    %c0_3 = arith.constant 0 : index
    %4 = vector.load %arg3[%c0_2, %c0_3] : memref<16x32xf32, #tpu.memory_space<vmem>>, vector<16x32xf32>
    %c0_4 = arith.constant 0 : index
    %c0_5 = arith.constant 0 : index
    %5 = vector.load %arg4[%c0_4, %c0_5] : memref<32x32xf32, #tpu.memory_space<vmem>>, vector<32x32xf32>
    %cst = arith.constant dense<0.000000e+00> : vector<16x32xf32>
    %6 = tpu.matmul %4, %5, %cst {dimension_numbers = #tpu.dot_dimension_numbers<[1], [0], [0], [1], [0, 0, 1, 1], [], []>} : vector<16x32xf32>, vector<32x32xf32>, vector<16x32xf32> -> vector<16x32xf32>
    %7 = arith.addf %3, %6 : vector<16x32xf32>
    %c0_6 = arith.constant 0 : index
    %c0_7 = arith.constant 0 : index
    %8 = vector.load %arg7[%c0_6, %c0_7] : memref<16x32xf32, #tpu.memory_space<vmem>>, vector<16x32xf32>
    tpu.vector_store %arg7[%c0_6, %c0_7], %7 {strides = array<i32>} : memref<16x32xf32, #tpu.memory_space<vmem>>, vector<16x32xf32>,
    %c0_i32_8 = arith.constant 0 : i32
    %9 = arith.cmpi eq, %arg2, %c0_i32_8 : i32
    %10 = arith.extui %9 : i1 to i32
    %c0_i32_9 = arith.constant 0 : i32
    %11 = arith.cmpi ne, %10, %c0_i32_9 : i32
    scf.if %11 {
      %c0_10 = arith.constant 0 : index
      %c0_11 = arith.constant 0 : index
      %12 = vector.load %arg7[%c0_10, %c0_11] : memref<16x32xf32, #tpu.memory_space<vmem>>, vector<16x32xf32>
      %c0_12 = arith.constant 0 : index
      %c0_13 = arith.constant 0 : index
      %13 = vector.load %arg5[%c0_12, %c0_13] : memref<1x32xf32, #tpu.memory_space<vmem>>, vector<1x32xf32>
      %14 = vector.broadcast %13 : vector<1x32xf32> to vector<16x32xf32>
      %15 = arith.addf %12, %14 : vector<16x32xf32>
      %c0_14 = arith.constant 0 : index
      %c0_15 = arith.constant 0 : index
      %16 = vector.load %arg6[%c0_14, %c0_15] : memref<16x32xf32, #tpu.memory_space<vmem>>, vector<16x32xf32>
      tpu.vector_store %arg6[%c0_14, %c0_15], %15 {strides = array<i32>} : memref<16x32xf32, #tpu.memory_space<vmem>>, vector<16x32xf32>,
    } else {
    }
    return
  }
  func.func @transform_0(%arg0: i32, %arg1: i32, %arg2: i32) -> (i32, i32) {
    %c0_i32 = arith.constant 0 : i32
    return %arg0, %arg2 : i32, i32
  }
  func.func @transform_1(%arg0: i32, %arg1: i32, %arg2: i32) -> (i32, i32) {
    %c0_i32 = arith.constant 0 : i32
    return %arg2, %arg1 : i32, i32
  }
  func.func @transform_2(%arg0: i32, %arg1: i32, %arg2: i32) -> (i32, i32) {
    %c0_i32 = arith.constant 0 : i32
    %c0_i32_0 = arith.constant 0 : i32
    return %c0_i32, %arg1 : i32, i32
  }
  func.func @transform_3(%arg0: i32, %arg1: i32, %arg2: i32) -> (i32, i32) {
    %c0_i32 = arith.constant 0 : i32
    return %arg0, %arg1 : i32, i32
  }
}

</mosaic_0001>

<bundles_post_ra>
// kernel: tpu_custom_call.1
= control target key start
LH: loop header
LB: loop body
LE: loop exit
PB: predicated region body
PF: predicated region fallthrough
CT: control target
= control target key end

     0   :  { %8 = vsyncpa [#allocation4], 0  ;;  %s275_s0 = inlined_call_operand.hbm [shape: f32[16,32], index: 0, kind: input, shape index: {}]   ;;  %s276_s1 = inlined_call_operand.hbm [shape: f32[32,32], index: 1, kind: input, shape index: {}]   ;;  %s277_s2 = inlined_call_operand.vmem [shape: f32[1,32], index: 2, kind: input, shape index: {}]   ;;  %s278_s3 = inlined_call_operand.hbm [shape: f32[16,32], index: 3, kind: output, shape index: {}]  }
   0x1   :  { %9 = vsyncpa [#allocation7], 0 }
   0x2   :  { %10 = vsyncpa [#allocation5], 0  ;;  %s15_s14 = sshll.u32 %s275_s0, 4  ;;  %s220_s15 = smov [#allocation3]   ;;  %s16_s14 = int_to_ptr.hbm [resolvable:$true] %s15_s14 }
   0x3   :  { %s17_s16 = sshll.u32 %s220_s15, 4  ;;  %s28_s19 = sshll.u32 %s276_s1, 4  ;;  %s18_s16 = int_to_ptr.vmem [resolvable:$true] %s17_s16  ;;  %s29_s19 = int_to_ptr.hbm [resolvable:$true] %s28_s19 }
   0x4   :  { %s221_s20 = smov 128   ;;  %s222_s21 = smov 8  }
   0x5   :  { %23 = dma.hbm_to_vmem [thread:$0]  %s16_s14, 256, %s18_s16, [#allocation4], %s221_s20, %s221_s20, %s222_s21  }
   0x6   :  { %s223_s22 = smov [#allocation6]  }
   0x7   :  { %s30_s23 = sshll.u32 %s223_s22, 4  ;;  %s31_s23 = int_to_ptr.vmem [resolvable:$true] %s30_s23 }
   0x8   :  { %36 = dma.hbm_to_vmem [thread:$0]  %s29_s19, 512, %s31_s23, [#allocation7], %s221_s20, %s221_s20, %s222_s21  }
   0x9   :  { %214 = dma.done.wait [#allocation4], 256  }
   0xa   :  { %215 = vsyncadd [#allocation4], 4294967040 }
   0xb   :  { %216 = dma.done.wait [#allocation7], 512  }
   0xc   :  { %217 = vsyncadd [#allocation7], 4294966784  ;;  %vm51_vm0 = vcmask 261120   ;;  %v224_v0 = vmov 0.0   ;;  %v61_v1 = vld [vmem:[#allocation6 + $0x18] sm:$0xff]  ;;  %v60_v2 = vld [vmem:[#allocation6 + $0x10] sm:$0xff] }
   0xd   :  { %52 = vst.msk [vmem:[#allocation2] sm:$0xff] %vm51_vm0, %v224_v0  ;;  %81 = vmatpush.msra.mxu0 %v61_v1  ;;  %131 = vmatpush.msra.mxu1 %v61_v1  ;;  %v59_v3 = vld [vmem:[#allocation6 + $0x8] sm:$0xff]  ;;  %v58_v4 = vld [vmem:[#allocation6] sm:$0xff]  ;;  %v56_v5 = vld [vmem:[#allocation3] sm:$0xff]  ;;  %s225_s24 = smov [#allocation8]   ;;  %s115_s28 = sshll.u32 %s278_s3, 4  ;;  %s116_s28 = int_to_ptr.hbm [resolvable:$true] %s115_s28 }
   0xe   :  { %53 = vst.msk [vmem:[#allocation2 + $0x8] sm:$0xff] %vm51_vm0, %v224_v0  ;;  %v57_v6 = vld [vmem:[#allocation3 + $0x8] sm:$0xff]  ;;  %v141_v13 = vld [vmem:[%s277_s2] ss:$0 sm:$0xff]  ;;  %s113_s25 = sshll.u32 %s225_s24, 4  ;;  %s114_s25 = int_to_ptr.vmem [resolvable:$true] %s113_s25 }
   0xf   :  { %82 = vmatpush.msra.mxu0 %v60_v2  ;;  %132 = vmatpush.msra.mxu1 %v60_v2 }
  0x11   :  { %83 = vmatpush.msra.mxu0 %v59_v3  ;;  %133 = vmatpush.msra.mxu1 %v59_v3 }
  0x13   :  { %84 = vmatpush.msra.mxu0 %v58_v4  ;;  %134 = vmatpush.msra.mxu1 %v58_v4 }
  0x14   :  { %129 = vmatmul.msk.f32.vlgmr.msra.gmra.mxu0 %vm51_vm0, %v56_v5  ;;  %130 = vmatmul.msk.f32.vlgmr.msra.gmra.mxu1 %vm51_vm0, %v57_v6  ;;  %v54_v7 = vld [vmem:[#allocation2] sm:$0xff] }
  0x15   :  { %v55_v8 = vld [vmem:[#allocation2 + $0x8] sm:$0xff] }
  0x91   :  { %v86_v9 = vpop.f32.mrf.mxu0  ;;  %v89_v10 = vpop.f32.mrf.mxu1 }
  0x92   :  { %v92_v11 = vadd.f32 %v86_v9, %v54_v7  ;;  %v93_v12 = vadd.f32 %v89_v10, %v55_v8 }
  0x94   :  { %94 = vst.msk [vmem:[#allocation2] sm:$0xff] %vm51_vm0, %v92_v11 }
  0x95   :  { %95 = vst.msk [vmem:[#allocation2 + $0x8] sm:$0xff] %vm51_vm0, %v93_v12 }
  0x9b   :  { %v99_v14 = vld [vmem:[#allocation2] sm:$0xff] }
  0x9c   :  { %v100_v15 = vld [vmem:[#allocation2 + $0x8] sm:$0xff]  ;;  %v105_v16 = vadd.f32 %v141_v13, %v99_v14 }
  0x9d   :  { %v106_v17 = vadd.f32 %v141_v13, %v100_v15 }
  0x9e   :  { %107 = vst.msk [vmem:[#allocation8] sm:$0xff] %vm51_vm0, %v105_v16 }
  0x9f   :  { %108 = vst.msk [vmem:[#allocation8 + $0x8] sm:$0xff] %vm51_vm0, %v106_v17 }
  0xa0   :  { %121 = dma.vmem_to_hbm [thread:$0]  %s114_s25, 256, %s116_s28, [#allocation5], %s221_s20, %s221_s20, %s222_s21  }
  0xa1   :  { %218 = dma.done.wait [#allocation5], 256  }
  0xa2   :  { %219 = vsyncadd [#allocation5], 4294967040 }
  0xa3   :  { %126 = vsyncpa [#allocation4], 1 }
  0xa4   :  { %127 = vsyncpa [#allocation7], 1 }
  0xa5   :  { %128 = vsyncpa [#allocation5], 1 }

</bundles_post_ra>
